<compile_context>
chip_gen: v5e
topology: v5e:2x2
jax: 0.10.0
libtpu: 0.0.40
codegen_flags: <defaults>
</compile_context>

<pallas_src>
import jax
import jax.numpy as jnp
from jax.experimental import pallas as pl
from jax.experimental.pallas import tpu as pltpu

VOCAB = 40 + 2            # nn.Embedding(40 + 2, 64)
EMB_DIM = 64
PACK = 2                  # labels packed per 128-lane output row (2 * 64 = 128)
LANES = PACK * EMB_DIM    # 128
MAX_ROWS = 1024           # packed rows per grid step (= 2048 labels, 512 KiB out tile)
SENTINEL = -128           # never matches iota in [0, 128) even after +EMB_DIM shift


def segment_embedding_kernel(labels_ref, table_ref, emb_ref):
    labels = labels_ref[...]                          # (rows, 2) int32
    valid = labels != -1                              # (rows, 2) bool
    # Out-of-range sentinel folds the mask into the one-hot compare:
    # padded positions never match any lane -> all-zero rows after the matmul.
    safe = jnp.where(valid, labels, SENTINEL)         # (rows, 2) int32

    rows = labels.shape[0]
    iota = jax.lax.broadcasted_iota(jnp.int32, (rows, LANES), dimension=1)

    # One-hot over a 128-wide K: pair element 0 hits columns [0, VOCAB),
    # pair element 1 hits columns [EMB_DIM, EMB_DIM + VOCAB).
    onehot = ((iota == safe[:, 0:1]) |
              (iota == (safe[:, 1:2] + EMB_DIM))).astype(jnp.float32)  # (rows, 128)

    # Block-diagonal table => (rows, 128) result packs two 64-wide embeddings
    # per lane-dense output row.
    emb_ref[...] = jnp.dot(onehot, table_ref[...],
                           preferred_element_type=jnp.float32)


def _choose_rows(n_pack):
    """Biggest power-of-two tile <= MAX_ROWS that still gives >= 2 grid steps."""
    rows = MAX_ROWS
    while rows > 8 and -(-n_pack // rows) < 2:
        rows //= 2
    return max(rows, 8)


def segment_embedding(output_labels, emb_table):
    """output_labels: (B, C, L) int, emb_table: (VOCAB, EMB_DIM) float32."""
    b, c, le = output_labels.shape
    n = b * c * le

    # Mask is a trivial elementwise op: compute it in plain JAX (XLA fuses it),
    # keeping the kernel's store path to a single lane-dense output stream.
    mask_labels = (output_labels != -1).astype(jnp.int32)

    n_pack = -(-n // PACK)
    rows = _choose_rows(n_pack)
    n_pack_pad = -(-n_pack // rows) * rows
    grid = n_pack_pad // rows

    flat = output_labels.reshape(n).astype(jnp.int32)
    flat = jnp.pad(flat, (0, PACK * n_pack_pad - n), constant_values=-1)
    packed_labels = flat.reshape(n_pack_pad, PACK)

    # Block-diagonal (128, 128) table:
    #   rows [0:VOCAB)       x cols [0:64)    -> table for pair element 0
    #   rows [64:64+VOCAB)   x cols [64:128)  -> table for pair element 1
    table = jnp.zeros((LANES, LANES), jnp.float32)
    table = table.at[:VOCAB, :EMB_DIM].set(emb_table.astype(jnp.float32))
    table = table.at[EMB_DIM:EMB_DIM + VOCAB, EMB_DIM:].set(
        emb_table.astype(jnp.float32))

    emb_packed = pl.pallas_call(
        segment_embedding_kernel,
        out_shape=jax.ShapeDtypeStruct((n_pack_pad, LANES), jnp.float32),
        grid_spec=pltpu.PrefetchScalarGridSpec(
            num_scalar_prefetch=0,
            grid=(grid,),
            in_specs=[
                pl.BlockSpec((rows, PACK), lambda i: (i, 0)),
                # Constant block index -> table is fetched once and held resident.
                pl.BlockSpec((LANES, LANES), lambda i: (0, 0)),
            ],
            out_specs=pl.BlockSpec((rows, LANES), lambda i: (i, 0)),
        ),
        compiler_params=pltpu.CompilerParams(
            dimension_semantics=("parallel",)),
    )(packed_labels, table)

    # Row-major reshape: (n_pack_pad, 128) -> (2*n_pack_pad, 64) un-packs pairs.
    tgt_emb = emb_packed.reshape(n_pack_pad * PACK, EMB_DIM)[:n]
    tgt_emb = tgt_emb.reshape(b, c, le, EMB_DIM)
    return tgt_emb, mask_labels


def _reference(output_labels, emb_table):
    mask = (output_labels != -1).astype(jnp.int32)
    idx = (output_labels * mask).astype(jnp.int32)
    emb = jnp.take(emb_table, idx, axis=0) * mask[..., None].astype(jnp.float32)
    return emb, mask


if __name__ == "__main__":
    key = jax.random.PRNGKey(0)
    k_lab, k_dur, k_emb, k_lab2 = jax.random.split(key, 4)

    # Deterministic parameter init (synthetic, no checkpoint load)
    emb_table = jax.random.normal(k_emb, (VOCAB, EMB_DIM), dtype=jnp.float32)

    # --- small test (matches the module's toy shapes) ---------------------
    B, C, L = 2, 3, 8
    output_labels = jax.random.randint(k_lab, (B, C, L), minval=-1, maxval=VOCAB,
                                       dtype=jnp.int32)
    output_duration = jax.random.uniform(k_dur, (B, C, L), dtype=jnp.float32)
    output = (output_labels, output_duration)  # duration unused by forward, kept for fidelity

    tgt_emb, mask_labels = segment_embedding(output[0], emb_table)
    tgt_emb = jax.block_until_ready(tgt_emb)
    mask_labels = jax.block_until_ready(mask_labels)

    ref_emb, ref_mask = _reference(output_labels, emb_table)
    assert tgt_emb.shape == (B, C, L, EMB_DIM)
    assert mask_labels.shape == (B, C, L)
    assert jnp.array_equal(mask_labels, ref_mask)
    assert jnp.allclose(tgt_emb, ref_emb, atol=1e-6)

    # --- larger test: exercises multi-step grid (>= 2 steps for v7x megacore)
    B2, C2, L2 = 2, 4, 640
    labels2 = jax.random.randint(k_lab2, (B2, C2, L2), minval=-1, maxval=VOCAB,
                                 dtype=jnp.int32)
    tgt2, mask2 = segment_embedding(labels2, emb_table)
    tgt2 = jax.block_until_ready(tgt2)
    mask2 = jax.block_until_ready(mask2)

    ref2, rmask2 = _reference(labels2, emb_table)
    assert jnp.array_equal(mask2, rmask2)
    assert jnp.allclose(tgt2, ref2, atol=1e-6)

    print("KERNEL_OK")
</pallas_src>

<mosaic_0001>
module attributes {stable_mosaic.version = 11 : i64} {
  func.func @segment_embedding_kernel(%arg0: i32, %arg1: memref<16x2xi32, #tpu.memory_space<vmem>>, %arg2: memref<128x128xf32, #tpu.memory_space<vmem>>, %arg3: memref<16x128xf32, #tpu.memory_space<vmem>>) attributes {dimension_semantics = [#tpu.dimension_semantics<parallel>], iteration_bounds = array<i64: 2>, scalar_prefetch = 0 : i64, scratch_operands = 0 : i64, tpu.core_type = #tpu.core_type<tc>, window_params = [{transform_indices = @transform_0, window_bounds = array<i64: 16, 2>}, {pipeline_mode = #tpu.pipeline_mode<synchronous>, transform_indices = @transform_1, window_bounds = array<i64: 128, 128>}, {transform_indices = @transform_2, window_bounds = array<i64: 16, 128>}]} {
    %c0 = arith.constant 0 : index
    %c0_0 = arith.constant 0 : index
    %0 = vector.load %arg1[%c0, %c0_0] : memref<16x2xi32, #tpu.memory_space<vmem>>, vector<16x2xi32>
    %c-1_i32 = arith.constant -1 : i32
    %1 = vector.broadcast %c-1_i32 : i32 to vector<16x2xi32>
    %2 = arith.cmpi ne, %0, %1 : vector<16x2xi32>
    %c-128_i32 = arith.constant -128 : i32
    %3 = vector.broadcast %c-128_i32 : i32 to vector<16x2xi32>
    %4 = arith.select %2, %0, %3 : vector<16x2xi1>, vector<16x2xi32>
    %5 = tpu.iota {dimensions = array<i32: 1>} : vector<16x128xi32>
    %6 = vector.extract_strided_slice %4 {offsets = [0, 0], sizes = [16, 1], strides = [1, 1]} : vector<16x2xi32> to vector<16x1xi32>
    %7 = vector.broadcast %6 : vector<16x1xi32> to vector<16x128xi32>
    %8 = arith.cmpi eq, %5, %7 : vector<16x128xi32>
    %9 = vector.extract_strided_slice %4 {offsets = [0, 1], sizes = [16, 1], strides = [1, 1]} : vector<16x2xi32> to vector<16x1xi32>
    %c64_i32 = arith.constant 64 : i32
    %10 = vector.broadcast %c64_i32 : i32 to vector<16x1xi32>
    %11 = arith.addi %9, %10 : vector<16x1xi32>
    %12 = vector.broadcast %11 : vector<16x1xi32> to vector<16x128xi32>
    %13 = arith.cmpi eq, %5, %12 : vector<16x128xi32>
    %14 = arith.ori %8, %13 : vector<16x128xi1>
    %15 = arith.extui %14 : vector<16x128xi1> to vector<16x128xi32>
    %16 = arith.sitofp %15 : vector<16x128xi32> to vector<16x128xf32>
    %c0_1 = arith.constant 0 : index
    %c0_2 = arith.constant 0 : index
    %17 = vector.load %arg2[%c0_1, %c0_2] : memref<128x128xf32, #tpu.memory_space<vmem>>, vector<128x128xf32>
    %cst = arith.constant dense<0.000000e+00> : vector<16x128xf32>
    %18 = tpu.matmul %16, %17, %cst {dimension_numbers = #tpu.dot_dimension_numbers<[1], [0], [0], [1], [0, 0, 1, 1], [], []>} : vector<16x128xf32>, vector<128x128xf32>, vector<16x128xf32> -> vector<16x128xf32>
    %c0_3 = arith.constant 0 : index
    %c0_4 = arith.constant 0 : index
    %19 = vector.load %arg3[%c0_3, %c0_4] : memref<16x128xf32, #tpu.memory_space<vmem>>, vector<16x128xf32>
    tpu.vector_store %arg3[%c0_3, %c0_4], %18 {strides = array<i32>} : memref<16x128xf32, #tpu.memory_space<vmem>>, vector<16x128xf32>,
    return
  }
  func.func @transform_0(%arg0: i32) -> (i32, i32) {
    %c0_i32 = arith.constant 0 : i32
    %c0_i32_0 = arith.constant 0 : i32
    return %arg0, %c0_i32 : i32, i32
  }
  func.func @transform_1(%arg0: i32) -> (i32, i32) {
    %c0_i32 = arith.constant 0 : i32
    %c0_i32_0 = arith.constant 0 : i32
    %c0_i32_1 = arith.constant 0 : i32
    return %c0_i32, %c0_i32_0 : i32, i32
  }
  func.func @transform_2(%arg0: i32) -> (i32, i32) {
    %c0_i32 = arith.constant 0 : i32
    %c0_i32_0 = arith.constant 0 : i32
    return %arg0, %c0_i32 : i32, i32
  }
}

</mosaic_0001>

<bundles_post_ra>
// kernel: tpu_custom_call.1
= control target key start
LH: loop header
LB: loop body
LE: loop exit
PB: predicated region body
PF: predicated region fallthrough
CT: control target
= control target key end

     0   :  { %7 = vsyncpa [#allocation3], 0  ;;  %s635_s0 = inlined_call_operand.vmem [shape: s32[32,2], index: 0, kind: input, shape index: {}]   ;;  %s636_s1 = inlined_call_operand.hbm [shape: f32[128,128], index: 1, kind: input, shape index: {}]   ;;  %s637_s2 = inlined_call_operand.hbm [shape: f32[32,128], index: 2, kind: output, shape index: {}]  }
   0x1   :  { %8 = vsyncpa [#allocation4], 0 }
   0x2   :  { %10 = vsyncpa [#allocation4 + $0x1], 0  ;;  %s541_s9 = smov 0   ;;  %s543_s10 = smov 0  }
   0x3   :  { %s545_s11 = smov 0   ;;  %s547_s12 = smov 0  }
   0x4 LB: > { %s562_s13 = sadd.s32 4294967295, %s516_s12   ;;  %s325_s14 = sadd.s32 4294967294, %s516_s12   ;;  %s516_s12 = sphi %s547_s12, %s643_s12   ;;  %s512_s11 = sphi %s545_s11, %s642_s11   ;;  %s508_s10 = sphi %s543_s10, %s641_s10   ;;  %s504_s9 = sphi %s541_s9, %s640_s9  }
   0x5   : > { %s566_s15 = sadd.s32 1, %s516_s12   ;;  %s70_s16 = sadd.s32 1, %s512_s11 }
   0x6   : > { %s67_s17 = ssub.s32 %s516_s12, %s566_s15  ;;  %p80_p0 = scmp.ne.s32.totalorder %s512_s11, %s508_s10 }
   0x7   : > { %p68_p1 = scmp.eq.s32.totalorder %s67_s17, 0  ;;  %p81_p2 = scmp.eq.s32.totalorder %s562_s13, 1 }
   0x8   : > { %p86_p3 = scmp.ne.s32.totalorder %s508_s10, %s504_s9  ;;  %p87_p4 = scmp.eq.s32.totalorder %s325_s14, 1 }
   0x9   : > { %s577_s18 = scalar_select %p68_p1, %s512_s11, %s70_s16  }
   0xa   : > { %p579_p5 = por %p81_p2, %p80_p0  ;;  %p583_p6 = por %p87_p4, %p86_p3 }
   0xb   : > { %p326_p7 = scmp.ge.s32.totalorder %s516_s12, 1  ;;  %p94_p8 = scmp.lt.s32.totalorder %s516_s12, 3 }
   0xc   : > { %p374_p9 = scmp.eq.s32.totalorder %s562_s13, 0  ;;  %s105_s23 = sshll.u32 %s636_s1, 4  ;;  %s106_s23 = int_to_ptr.hbm [resolvable:$true] %s105_s23 }
   0xd   : > { %p95_p10 = pnand %p326_p7, %p94_p8  ;;  %s518_s24 = smov [#allocation2]  }
   0xe   : > { %s107_s25 = sshll.u32 %s518_s24, 4  ;;  %s519_s26 = smov 128   ;;  %s108_s25 = int_to_ptr.vmem [resolvable:$true] %s107_s25 }
   0xf   : > { %p366_p11 = pneg %p95_p10  ;;  %s520_s27 = smov 8  }
  0x10   : > { %132 = sbr.rel (%p95_p10) target bundleno = 288 (0x120), region = 28 }
  0x11   : > { %p367_p12 = pnand %p374_p9, %p366_p11 }
  0x13   : > { %369 = dma.hbm_to_vmem [thread:$0]  (!%p367_p12), %s106_s23, 2048, %s108_s25, [#allocation3], %s519_s26, %s519_s26, %s520_s27  }
  0x15   : > { %495 = dma.done.wait (%p374_p9), [#allocation3], 2048  }
  0x16   : > { %497 = vsyncadd (%p374_p9), [#allocation3], 4294965248  ;;  %s332_s28 = sshll.u32 %s562_s13, 1  ;;  %v521_v0 = vmov 0   ;;  %v522_v1 = vmov 1   ;;  %v209_v4 = vld [vmem:[#allocation2 + $0x78] sm:$0xff]  ;;  %v168_v24 = vlaneseq }
  0x17   : > { %417 = vset.pattern.permute.xlu0 %v521_v0  ;;  %p156_p13 = scmp.lt.s32.totalorder %s332_s28, 3  ;;  %418 = vset.pattern.permute.xlu1 %v522_v1  ;;  %v208_v5 = vld [vmem:[#allocation2 + $0x70] sm:$0xff]  ;;  %v207_v7 = vld [vmem:[#allocation2 + $0x68] sm:$0xff]  ;;  %v206_v9 = vld [vmem:[#allocation2 + $0x60] sm:$0xff]  ;;  %v523_v28 = vmov 1.0   ;;  %s152_s5 = sand.u32 1, %s508_s10  }
  0x18   : > { %210 = vmatpush.msra.mxu0 %v209_v4  ;;  %344 = vmatpush.msra.mxu1 %v209_v4  ;;  %v205_v11 = vld [vmem:[#allocation2 + $0x58] sm:$0xff]  ;;  %v204_v12 = vld [vmem:[#allocation2 + $0x50] sm:$0xff]  ;;  %v203_v14 = vld [vmem:[#allocation2 + $0x48] sm:$0xff]  ;;  %v169_v25 = vand.u32 127, %v168_v24  ;;  %s331_s6 = sshll.u32 %s152_s5, 4  ;;  %s343_s7 = sshll.u32 %s562_s13, 4 }
  0x19   : > { %s645_s28 = smov (!%p156_p13, %s332_s28), 3  ;;  %v202_v15 = vld [vmem:[#allocation2 + $0x40] sm:$0xff]  ;;  %v201_v16 = vld [vmem:[#allocation2 + $0x38] sm:$0xff]  ;;  %v200_v17 = vld [vmem:[#allocation2 + $0x30] sm:$0xff]  ;;  %s247_s16 = scalar_lea.hbm %s637_s2, %s343_s7 }
  0x1a   : > { %s333_s29 = sshll.u32 %s645_s28, 3  ;;  %211 = vmatpush.msra.mxu0 %v208_v5  ;;  %345 = vmatpush.msra.mxu1 %v208_v5  ;;  %v199_v18 = vld [vmem:[#allocation2 + $0x28] sm:$0xff]  ;;  %v198_v19 = vld [vmem:[#allocation2 + $0x20] sm:$0xff]  ;;  %v197_v20 = vld [vmem:[#allocation2 + $0x18] sm:$0xff]  ;;  %s154_s17 = scalar_lea.vmem [#allocation5], %s331_s6 }
  0x1b   : > { %s159_s4 = scalar_lea.vmem %s635_s0, %s333_s29  ;;  %v196_v21 = vld [vmem:[#allocation2 + $0x10] sm:$0xff]  ;;  %v195_v22 = vld [vmem:[#allocation2 + $0x8] sm:$0xff]  ;;  %v194_v23 = vld [vmem:[#allocation2] sm:$0xff]  ;;  %s248_s21 = sshll.u32 %s154_s17, 4  ;;  %s249_s21 = int_to_ptr.vmem [resolvable:$true] %s248_s21 }
  0x1c   : > { %v162_v2 = vld [vmem:[%s159_s4] sm:$0xff]  ;;  %v163_v3 = vld [vmem:[%s159_s4 + $0x8] sm:$0xff]  ;;  %212 = vmatpush.msra.mxu0 %v207_v7  ;;  %346 = vmatpush.msra.mxu1 %v207_v7  ;;  %s250_s22 = sshll.u32 %s247_s16, 4  ;;  %s236_s23 = scalar_lea.sflag [#allocation4], %s152_s5  ;;  %s251_s22 = int_to_ptr.hbm [resolvable:$true] %s250_s22 }
  0x1d   : > { %vm164_vm0 = vcmp.ne.s32.totalorder %v162_v2, 4294967295  ;;  %vm165_vm1 = vcmp.ne.s32.totalorder %v163_v3, 4294967295  ;;  %s464_s24 = sshra.s32 %s251_s22, 4  ;;  %s470_s27 = scalar_lea.hbm %s637_s2, 32  ;;  %s465_s24 = int_to_ptr.hbm [resolvable:$true] %s464_s24 }
  0x1e   : > { %v166_v6 = vsel %vm164_vm0, %v162_v2, 4294967168  ;;  %v167_v10 = vsel %vm165_vm1, %v163_v3, 4294967168  ;;  %213 = vmatpush.msra.mxu0 %v206_v9  ;;  %347 = vmatpush.msra.mxu1 %v206_v9  ;;  %s466_s25 = scalar_lea.hbm %s465_s24, 16  ;;  %p471_p3 = scmp.lt.s32.totalorder %s465_s24, %s637_s2 }
  0x1f   : > { %171 = vperm.xlu0 %417, %v166_v6   ;;  %v178_v8 = vadd.s32 64, %v166_v6  ;;  %v179_v13 = vadd.s32 64, %v167_v10  ;;  %p467_p0 = scmp.ne.s32.totalorder %s465_s24, %s466_s25  ;;  %p472_p4 = scmp.lt.s32.totalorder %s470_s27, %s466_s25 }
  0x20   : > { %214 = vmatpush.msra.mxu0 %v205_v11  ;;  %348 = vmatpush.msra.mxu1 %v205_v11 }
  0x21   : > { %181 = vperm.xlu1 %418, %v178_v8   ;;  %p468_p1 = pnand %p467_p0, %p579_p5  ;;  %p473_p7 = por %p472_p4, %p471_p3 }
  0x22   : > { %215 = vmatpush.msra.mxu0 %v204_v12  ;;  %349 = vmatpush.msra.mxu1 %v204_v12 }
  0x23   : > { %p469_p2 = pneg %p468_p1 }
  0x24   : > { %216 = vmatpush.msra.mxu0 %v203_v14  ;;  %350 = vmatpush.msra.mxu1 %v203_v14 }
  0x25   : > { %p474_p8 = pnand %p473_p7, %p469_p2 }
  0x26   : > { %217 = vmatpush.msra.mxu0 %v202_v15  ;;  %351 = vmatpush.msra.mxu1 %v202_v15 }
  0x27   : > { %174 = vperm.xlu0 %417, %v167_v10  }
  0x28   : > { %218 = vmatpush.msra.mxu0 %v201_v16  ;;  %352 = vmatpush.msra.mxu1 %v201_v16 }
  0x29   : > { %184 = vperm.xlu1 %418, %v179_v13  }
  0x2a   : > { %219 = vmatpush.msra.mxu0 %v200_v17  ;;  %353 = vmatpush.msra.mxu1 %v200_v17 }
  0x2c   : > { %220 = vmatpush.msra.mxu0 %v199_v18  ;;  %354 = vmatpush.msra.mxu1 %v199_v18 }
  0x2e   : > { %221 = vmatpush.msra.mxu0 %v198_v19  ;;  %355 = vmatpush.msra.mxu1 %v198_v19 }
  0x2f   : > { %419 = vset.pattern.permute.xlu0 %v522_v1 }
  0x30   : > { %222 = vmatpush.msra.mxu0 %v197_v20  ;;  %356 = vmatpush.msra.mxu1 %v197_v20 }
  0x32   : > { %223 = vmatpush.msra.mxu0 %v196_v21  ;;  %357 = vmatpush.msra.mxu1 %v196_v21 }
  0x34   : > { %224 = vmatpush.msra.mxu0 %v195_v22  ;;  %358 = vmatpush.msra.mxu1 %v195_v22 }
  0x36   : > { %225 = vmatpush.msra.mxu0 %v194_v23  ;;  %359 = vmatpush.msra.mxu1 %v194_v23 }
  0x91   : > { %v172_v26 = vpop.permute.xlu0 %171 }
  0x92   : > { %vm176_vm2 = vcmp.eq.s32.totalorder %v169_v25, %v172_v26 }
  0x93   : > { %v182_v27 = vpop.permute.xlu1 %181 }
  0x94   : > { %vm186_vm3 = vcmp.eq.s32.totalorder %v169_v25, %v182_v27 }
  0x95   : > { %vm188_vm4 = vmor %vm176_vm2, %vm186_vm3 }
  0x96   : > { %336 = vmatmul.msk.f32.vlgmr.msra.gmra.mxu0 %vm188_vm4, %v523_v28 }
  0x99   : > { %v175_v29 = vpop.permute.xlu0 %174 }
  0x9a   : > { %vm177_vm5 = vcmp.eq.s32.totalorder %v169_v25, %v175_v29 }
  0x9b   : > { %v185_v30 = vpop.permute.xlu1 %184 }
  0x9c   : > { %vm187_vm6 = vcmp.eq.s32.totalorder %v169_v25, %v185_v30 }
  0x9d   : > { %vm189_vm7 = vmor %vm177_vm5, %vm187_vm6 }
  0x9e   : > { %337 = vmatmul.msk.f32.vlgmr.msra.gmra.mxu1 %vm189_vm7, %v523_v28 }
 0x113   : > { %v227_v31 = vpop.f32.mrf.mxu0 }
 0x114   : > { %233 = vst [vmem:[%s154_s17] sm:$0xff] %v227_v31 }
 0x11b   : > { %v230_v32 = vpop.f32.mrf.mxu1 }
 0x11c   : > { %234 = vst [vmem:[%s154_s17 + $0x8] sm:$0xff] %v230_v32 }
 0x11d   : > { %477 = shalt.err (!%p474_p8)
}
 0x11e   : > { %s524_s30 = smov 128   ;;  %s525_s3 = smov 8  }
 0x11f   : > { %364 = dma.vmem_to_hbm [thread:$0]  (%p579_p5), %s249_s21, 256, %s251_s22, %s236_s23, %s524_s30, %s524_s30, %s525_s3  }
 0x120 PF: > { %p376_p9 = scmp.ge.s32.totalorder %s516_s12, 2  ;;  %s265_s4 = sand.u32 1, %s504_s9  }
 0x121   : > { %s266_s5 = scalar_lea.sflag [#allocation4], %s265_s4 }
 0x122   : > { %p371_p10 = pnand %p376_p9, %p583_p6 }
 0x124   : > { %p372_p11 = pneg %p371_p10 }
 0x126   : > { %499 = dma.done.wait (%p372_p11), %s266_s5, 256  }
 0x127   : > { %501 = vsyncadd (%p372_p11), %s266_s5, 4294967040  ;;  %p13_p12 = scmp.ge.s32.totalorder %s566_s15, 4   ;;  %s640_s9 = smov %s508_s10 }
 0x128   : > { %s641_s10 = smov %s512_s11  ;;  %s642_s11 = smov %s577_s18 }
 0x129   : > { %s643_s12 = smov %s566_s15  ;;  %15 = sbr.rel (!%p13_p12) target bundleno = 4 (0x4), region = 68 }
 0x12e   :  { %272 = vsyncpa [#allocation3], 1 }
 0x12f   :  { %274 = vsyncpa [#allocation3 + $0x1], 1 }
 0x130   :  { %275 = vsyncpa [#allocation4], 1 }
 0x131   :  { %277 = vsyncpa [#allocation4 + $0x1], 1 }

</bundles_post_ra>
